<compile_context>
chip_gen: v7x
topology: tpu7x:2x2x1
jax: 0.10.0
libtpu: 0.0.40
codegen_flags: <defaults>
</compile_context>

<pallas_src>
import jax
import jax.numpy as jnp
from jax.experimental import pallas as pl
from jax.experimental.pallas import tpu as pltpu


def _ceil_to(n: int, m: int) -> int:
    return ((n + m - 1) // m) * m


def _output_decoder_kernel(x_ref, w_ref, b_ref, o_ref):
    # x_ref : (TB, D)   VMEM  -- streamed batch tile, D on lanes (x dtype)
    # w_ref : (3, D)    VMEM  -- Linear weight (PyTorch layout), resident
    # b_ref : (3, 1)    VMEM  -- bias column (f32), resident
    # o_ref : (3, TB)   VMEM  -- lane-dense transposed output tile (f32)
    #
    # y^T = W @ x^T : contract D on both operands (q @ k.T style dot_general),
    # result lands directly in the lane-dense (3, TB) layout; f32 accumulate.
    yt = jax.lax.dot_general(
        w_ref[...], x_ref[...],
        dimension_numbers=(((1,), (1,)), ((), ())),
        preferred_element_type=jnp.float32,
    ) + b_ref[...]                                            # (3, TB) f32

    # F.normalize(y, dim=-1):  y / max(||y||_2, 1e-12)
    #                       == y * rsqrt(max(||y||_2^2, 1e-24))   (exact rewrite)
    eps_sq = jnp.float32(1e-24)
    sq = jnp.sum(yt * yt, axis=0, keepdims=True)              # (1, TB)
    inv = jax.lax.rsqrt(jnp.maximum(sq, eps_sq))              # (1, TB)  EUP
    o_ref[...] = (yt * inv).astype(o_ref.dtype)


def output_decoder_forward(x, weight, bias, *, block_batch=16384,
                           small_batch_fallback=1024,
                           return_transposed=False):
    """Cartesian OutputDecoder forward.

    x:      (B, D) float32 or bfloat16
    weight: (3, D) float32  (PyTorch nn.Linear layout)
    bias:   (3,)   float32
    returns (B, 3) in x.dtype, rows L2-normalized (torch.F.normalize semantics).
            If return_transposed=True, returns the kernel-native (3, B) layout
            (skips the wrapper-side transpose pass).
    """
    assert block_batch % 128 == 0, "block_batch must be a multiple of 128"
    B, D = x.shape
    out_dim = weight.shape[0]

    # --- small-batch fallback: let XLA fuse the tiny matmul + normalize -----
    if B <= small_batch_fallback:
        y = (x.astype(jnp.float32) @ weight.astype(jnp.float32).T
             + bias.astype(jnp.float32))
        denom = jnp.maximum(
            jnp.sqrt(jnp.sum(y * y, axis=-1, keepdims=True)), 1e-12)
        out = (y / denom).astype(x.dtype)
        return out.T if return_transposed else out

    # --- tile selection -----------------------------------------------------
    # TB must be a multiple of 128 so output stores stay lane-dense and the
    # x block's sublane dim is aligned.  For mid-size batches force >= 2 grid
    # steps so the "parallel" axis can shard across both v7x TensorCores.
    if B <= block_batch:
        tb = min(_ceil_to(pl.cdiv(B, 2), 128), block_batch)
    else:
        tb = block_batch
    grid = (pl.cdiv(B, tb),)    # partial trailing block handled by Pallas

    w = weight.astype(x.dtype)                       # stream to MXU in x dtype
    b_col = bias.reshape(out_dim, 1).astype(jnp.float32)

    # --- VMEM budget (double-buffered x + output tiles, lane/sublane padded) -
    x_tile_bytes = tb * _ceil_to(D, 128) * x.dtype.itemsize
    out_tile_bytes = _ceil_to(out_dim, 8) * tb * 4
    w_bytes = _ceil_to(out_dim, 8) * _ceil_to(D, 128) * x.dtype.itemsize
    vmem_limit = 2 * (x_tile_bytes + out_tile_bytes) + w_bytes + (2 << 20)
    vmem_limit = max(16 << 20, min(vmem_limit, 48 << 20))

    out_t = pl.pallas_call(
        _output_decoder_kernel,
        out_shape=jax.ShapeDtypeStruct((out_dim, B), jnp.float32),
        grid_spec=pltpu.PrefetchScalarGridSpec(
            num_scalar_prefetch=0,
            grid=grid,
            in_specs=[
                pl.BlockSpec((tb, D), lambda i: (i, 0)),        # x: streamed
                pl.BlockSpec((out_dim, D), lambda i: (0, 0)),   # W: resident
                pl.BlockSpec((out_dim, 1), lambda i: (0, 0)),   # b: resident
            ],
            out_specs=pl.BlockSpec((out_dim, tb), lambda i: (0, i)),
        ),
        compiler_params=pltpu.CompilerParams(
            dimension_semantics=("parallel",),
            vmem_limit_bytes=vmem_limit,
        ),
        cost_estimate=pl.CostEstimate(
            flops=2 * B * D * out_dim + 8 * B * out_dim,
            transcendentals=B,
            bytes_accessed=(B * D * x.dtype.itemsize
                            + out_dim * D * x.dtype.itemsize
                            + out_dim * 4
                            + out_dim * B * 4),
        ),
    )(x, w, b_col)

    out_t = out_t.astype(x.dtype)
    # Kernel-native layout is (3, B); transpose back only if the caller needs
    # the module's (B, 3) layout.
    return out_t if return_transposed else out_t.T


def _reference(x, weight, bias):
    y = (x.astype(jnp.float32) @ weight.astype(jnp.float32).T
         + bias.astype(jnp.float32))
    denom = jnp.maximum(jnp.sqrt(jnp.sum(y * y, axis=-1, keepdims=True)), 1e-12)
    return y / denom


if __name__ == "__main__":
    key = jax.random.PRNGKey(0)
    kx, kw, kb, kx2, kx3 = jax.random.split(key, 5)

    # Shapes consistent with the module: Linear(input_size=32, 3).
    D, OUT = 32, 3
    weight = jax.random.normal(kw, (OUT, D), dtype=jnp.float32) * 0.1
    bias = jax.random.normal(kb, (OUT,), dtype=jnp.float32) * 0.1

    # 1) Module-typical tiny batch (B=8): goes through the fused-JAX fallback.
    B1 = 8
    x1 = jax.random.normal(kx, (B1, D), dtype=jnp.float32)
    out1 = jax.block_until_ready(output_decoder_forward(x1, weight, bias))
    ref1 = _reference(x1, weight, bias)
    assert out1.shape == (B1, OUT)
    assert jnp.allclose(out1, ref1, atol=1e-5, rtol=1e-5)

    # 2) Kernel path, divisible batch: B=2048 -> tb=1024, 2 grid steps.
    B2 = 2048
    x2 = jax.random.normal(kx2, (B2, D), dtype=jnp.float32)
    out2 = jax.block_until_ready(output_decoder_forward(x2, weight, bias))
    ref2 = _reference(x2, weight, bias)
    assert out2.shape == (B2, OUT)
    assert jnp.allclose(out2, ref2, atol=1e-5, rtol=1e-5)

    # 3) Kernel path, ragged batch (forced small fallback off): B=300 ->
    #    tb=256, 2 grid steps with a partial trailing block (no jnp.pad).
    B3 = 300
    x3 = jax.random.normal(kx3, (B3, D), dtype=jnp.float32)
    out3 = jax.block_until_ready(
        output_decoder_forward(x3, weight, bias, small_batch_fallback=0))
    ref3 = _reference(x3, weight, bias)
    assert out3.shape == (B3, OUT)
    assert jnp.allclose(out3, ref3, atol=1e-5, rtol=1e-5)

    # 4) Kernel path with bf16 activations (halved x HBM stream), and the
    #    transposed (3, B) output layout.
    x4 = x2.astype(jnp.bfloat16)
    out4 = jax.block_until_ready(
        output_decoder_forward(x4, weight, bias, return_transposed=True))
    ref4 = _reference(x4, weight.astype(jnp.bfloat16).astype(jnp.float32), bias)
    assert out4.shape == (OUT, B2)
    assert jnp.allclose(out4.astype(jnp.float32).T, ref4, atol=5e-2)

    print("KERNEL_OK")
</pallas_src>

<mosaic_0001>
module attributes {stable_mosaic.version = 11 : i64} {
  func.func @_output_decoder_kernel(%arg0: i32, %arg1: memref<1024x32xf32, #tpu.memory_space<vmem>>, %arg2: memref<3x32xf32, #tpu.memory_space<vmem>>, %arg3: memref<3x1xf32, #tpu.memory_space<vmem>>, %arg4: memref<3x1024xf32, #tpu.memory_space<vmem>>) attributes {dimension_semantics = [#tpu.dimension_semantics<parallel>], iteration_bounds = array<i64: 2>, scalar_prefetch = 0 : i64, scratch_operands = 0 : i64, tpu.core_type = #tpu.core_type<tc>, window_params = [{transform_indices = @transform_0, window_bounds = array<i64: 1024, 32>}, {pipeline_mode = #tpu.pipeline_mode<synchronous>, transform_indices = @transform_1, window_bounds = array<i64: 3, 32>}, {pipeline_mode = #tpu.pipeline_mode<synchronous>, transform_indices = @transform_2, window_bounds = array<i64: 3, 1>}, {transform_indices = @transform_3, window_bounds = array<i64: 3, 1024>}]} {
    %c0 = arith.constant 0 : index
    %c0_0 = arith.constant 0 : index
    %0 = vector.load %arg2[%c0, %c0_0] : memref<3x32xf32, #tpu.memory_space<vmem>>, vector<3x32xf32>
    %c0_1 = arith.constant 0 : index
    %c0_2 = arith.constant 0 : index
    %1 = vector.load %arg1[%c0_1, %c0_2] : memref<1024x32xf32, #tpu.memory_space<vmem>>, vector<1024x32xf32>
    %cst = arith.constant dense<0.000000e+00> : vector<3x1024xf32>
    %2 = tpu.matmul %0, %1, %cst {dimension_numbers = #tpu.dot_dimension_numbers<[1], [1], [0], [0], [0, 0, 1, 0], [], []>} : vector<3x32xf32>, vector<1024x32xf32>, vector<3x1024xf32> -> vector<3x1024xf32>
    %c0_3 = arith.constant 0 : index
    %c0_4 = arith.constant 0 : index
    %3 = vector.load %arg3[%c0_3, %c0_4] : memref<3x1xf32, #tpu.memory_space<vmem>>, vector<3x1xf32>
    %4 = vector.broadcast %3 : vector<3x1xf32> to vector<3x1024xf32>
    %5 = arith.addf %2, %4 : vector<3x1024xf32>
    %6 = arith.mulf %5, %5 : vector<3x1024xf32>
    %cst_5 = arith.constant dense<0.000000e+00> : vector<1024xf32>
    %7 = vector.multi_reduction <add>, %6, %cst_5 [0] : vector<3x1024xf32> to vector<1024xf32>
    %8 = vector.shape_cast %7 : vector<1024xf32> to vector<1x1024xf32>
    %cst_6 = arith.constant 1.000000e-24 : f32
    %9 = vector.broadcast %cst_6 : f32 to vector<1x1024xf32>
    %10 = arith.maximumf %8, %9 : vector<1x1024xf32>
    %11 = math.rsqrt %10 : vector<1x1024xf32>
    %12 = vector.broadcast %11 : vector<1x1024xf32> to vector<3x1024xf32>
    %13 = arith.mulf %5, %12 : vector<3x1024xf32>
    %c0_7 = arith.constant 0 : index
    %c0_8 = arith.constant 0 : index
    %14 = vector.load %arg4[%c0_7, %c0_8] : memref<3x1024xf32, #tpu.memory_space<vmem>>, vector<3x1024xf32>
    tpu.vector_store %arg4[%c0_7, %c0_8], %13 {strides = array<i32>} : memref<3x1024xf32, #tpu.memory_space<vmem>>, vector<3x1024xf32>,
    return
  }
  func.func @transform_0(%arg0: i32) -> (i32, i32) {
    %c0_i32 = arith.constant 0 : i32
    %c0_i32_0 = arith.constant 0 : i32
    return %arg0, %c0_i32 : i32, i32
  }
  func.func @transform_1(%arg0: i32) -> (i32, i32) {
    %c0_i32 = arith.constant 0 : i32
    %c0_i32_0 = arith.constant 0 : i32
    %c0_i32_1 = arith.constant 0 : i32
    return %c0_i32, %c0_i32_0 : i32, i32
  }
  func.func @transform_2(%arg0: i32) -> (i32, i32) {
    %c0_i32 = arith.constant 0 : i32
    %c0_i32_0 = arith.constant 0 : i32
    %c0_i32_1 = arith.constant 0 : i32
    return %c0_i32, %c0_i32_0 : i32, i32
  }
  func.func @transform_3(%arg0: i32) -> (i32, i32) {
    %c0_i32 = arith.constant 0 : i32
    %c0_i32_0 = arith.constant 0 : i32
    return %c0_i32, %arg0 : i32, i32
  }
}

</mosaic_0001>

<bundles_post_ra>
// kernel: tpu_custom_call.1
= control target key start
LH: loop header
LB: loop body
LE: loop exit
PB: predicated region body
PF: predicated region fallthrough
CT: control target
= control target key end

     0   :  { %8 = vsyncpa [#allocation3], 0  ;;  %s2194_s0 = inlined_call_operand.vmem [shape: f32[2048,32], index: 0, kind: input, shape index: {}]   ;;  %s2195_s1 = inlined_call_operand.vmem [shape: f32[3,32], index: 1, kind: input, shape index: {}]   ;;  %s2196_s2 = inlined_call_operand.vmem [shape: f32[3,1], index: 2, kind: input, shape index: {}]   ;;  %s2197_s3 = inlined_call_operand.hbm [shape: f32[3,2048], index: 3, kind: output, shape index: {}]  }
   0x1   :  { %10 = vsyncpa [#allocation3 + $0x1], 0  ;;  %s1778_s12 = smov 0   ;;  %s1780_s13 = smov 0  }
   0x2   :  { %s1782_s14 = smov 0   ;;  %s1784_s15 = smov 0  }
   0x3 LB: > { %s1799_s16 = sadd.s32 4294967295, %s1754_s15   ;;  %s1162_s17 = sadd.s32 4294967294, %s1754_s15   ;;  %s1754_s15 = sphi %s1784_s15, %s2205_s15   ;;  %s1750_s14 = sphi %s1782_s14, %s2204_s14   ;;  %s1746_s13 = sphi %s1780_s13, %s2203_s13   ;;  %s1742_s12 = sphi %s1778_s12, %s2202_s12  }
   0x4   : > { %s1803_s18 = sadd.s32 1, %s1754_s15   ;;  %s91_s19 = sadd.s32 1, %s1750_s14 }
   0x5   : > { %s88_s20 = ssub.s32 %s1754_s15, %s1803_s18  ;;  %p101_p0 = scmp.ne.s32.totalorder %s1750_s14, %s1746_s13 }
   0x6   : > { %p89_p1 = scmp.eq.s32.totalorder %s88_s20, 0  ;;  %p102_p2 = scmp.eq.s32.totalorder %s1799_s16, 1 }
   0x7   : > { %p107_p3 = scmp.ne.s32.totalorder %s1746_s13, %s1742_s12  ;;  %p108_p4 = scmp.eq.s32.totalorder %s1162_s17, 1 }
   0x8   : > { %s1814_s21 = scalar_select %p89_p1, %s1750_s14, %s91_s19  }
   0x9   : > { %p1816_p5 = por %p102_p2, %p101_p0  ;;  %p1820_p6 = por %p108_p4, %p107_p3 }
   0xa   : > { %p1165_p7 = scmp.ge.s32.totalorder %s1754_s15, 1  ;;  %p141_p8 = scmp.lt.s32.totalorder %s1754_s15, 3 }
   0xc   : > { %p142_p9 = pnand %p1165_p7, %p141_p8 }
   0xd   : > { %s1167_s24 = sshll.u32 (!%p142_p9), %s1799_s16, 7  ;;  %vm307_vm0 = vcmask (!%p142_p9), 261120   ;;  %v1830_v0 = vld [vmem:[%s2195_s1] sm:$0x7] (!%p142_p9)  ;;  %v1756_v23 = vmov (!%p142_p9), 0   ;;  %vm987_vm2 = vcmask (!%p142_p9), 1042432  }
   0xe   : > { %145 = sbr.rel (%p142_p9) target bundleno = 419 (0x1a3), region = 32  ;;  %p166_p10 = scmp.lt.s32.totalorder (!%p142_p9), %s1167_s24, 255  ;;  %1339 = vmatprep.mubr.msk.f32.mxu0 (!%p142_p9), %vm307_vm0, %v1830_v0  ;;  %1373 = vmatprep.mubr.msk.f32.mxu1 (!%p142_p9), %vm307_vm0, %v1830_v0  ;;  %vm1843_vm1 = vmpackc.low (!%p142_p9), %vm307_vm0, %vm307_vm0 }
   0xf   : > { %1675 = vset.pattern.permute.xlu0 (!%p142_p9), %v1756_v23  ;;  %s162_s6 = sand.u32 (!%p142_p9), 1, %s1746_s13   ;;  %s1306_s9 = sshll.u32 (!%p142_p9), %s1799_s16, 9 }
  0x10   : > { %s1166_s7 = sshll.u32 (!%p142_p9), %s162_s6, 5  ;;  %s2148_s19 = scalar_lea.hbm (!%p142_p9), %s2197_s3, %s1306_s9 }
  0x11   : > { %s2131_s8 = scalar_lea.vmem (!%p142_p9), [#allocation2], %s1166_s7  ;;  %s1089_s20 = scalar_lea.sflag (!%p142_p9), [#allocation3], %s162_s6 }
  0x12   : > { %s1103_s10 = sshll.u32 (!%p142_p9), %s2131_s8, 4  ;;  %s1757_s16 = smov (!%p142_p9), [#allocation2]   ;;  %s2150_s10 = int_to_ptr.vmem [resolvable:$true] %s1103_s10 }
  0x13   : > { %s1696_s25 = sshll.u32 (!%p142_p9), %s1757_s16, 4  ;;  %s1697_s25 = int_to_ptr.vmem [resolvable:$false] %s1696_s25 }
  0x14   : > { %s1698_s26 = scalar_lea.vmem (!%p142_p9), %s1697_s25, 1024  ;;  %p1699_p0 = scmp.lt.s32.totalorder (!%p142_p9), %s2150_s10, %s1697_s25 }
  0x15   : > { %s2207_s24 = smov (!%p166_p10, %s1167_s24), 255 }
  0x16   : > { %s1168_s27 = sshll.u32 %s2207_s24, 3  ;;  %s1692_s24 = scalar_lea.vmem %s2150_s10, 512 }
  0x17   : > { %s1839_s30 = scalar_lea.vmem %s2194_s0, %s1168_s27  ;;  %p1693_p11 = scmp.ne.s32.totalorder %s2150_s10, %s1692_s24 }
  0x18   : > { %v189_v2 = vld [vmem:[%s1839_s30 + $0x80] sm:$0xff]  ;;  %v190_v3 = vld [vmem:[%s1839_s30 + $0x88] sm:$0xff]  ;;  %v191_v13 = vld [vmem:[%s1839_s30 + $0x90] sm:$0xff]  ;;  %p1700_p1 = scmp.lt.s32.totalorder %s1698_s26, %s1692_s24 }
  0x19   : > { %v221_v4 = vld [vmem:[%s1839_s30 + $0x180] sm:$0xff]  ;;  %v1443_v5 = vpack.c.bf16 %v190_v3, %v189_v2  ;;  %v222_v6 = vld [vmem:[%s1839_s30 + $0x188] sm:$0xff]  ;;  %v192_v15 = vld [vmem:[%s1839_s30 + $0x98] sm:$0xff]  ;;  %p1694_p12 = pnand %p1693_p11, %p1816_p5 }
  0x1a   : > { %v173_v7 = vld [vmem:[%s1839_s30] sm:$0xff]  ;;  %v174_v8 = vld [vmem:[%s1839_s30 + $0x8] sm:$0xff]  ;;  %v1491_v9 = vpack.c.bf16 %v222_v6, %v221_v4  ;;  %v223_v16 = vld [vmem:[%s1839_s30 + $0x190] sm:$0xff]  ;;  %v1449_v18 = vpack.c.bf16 %v192_v15, %v191_v13  ;;  %p1701_p2 = por %p1700_p1, %p1699_p0 }
  0x1b   : > { %v1446_v10 = vpack.c.bf16 %v174_v8, %v173_v7  ;;  %v205_v11 = vld [vmem:[%s1839_s30 + $0x100] sm:$0xff]  ;;  %v206_v12 = vld [vmem:[%s1839_s30 + $0x108] sm:$0xff]  ;;  %1445 = vmatprep.subr.msk.bf16.mxu0 %vm1843_vm1, %v1443_v5  ;;  %v224_v17 = vld [vmem:[%s1839_s30 + $0x198] sm:$0xff]  ;;  %p1695_p13 = pneg %p1694_p12 }
  0x1c   : > { %v1494_v14 = vpack.c.bf16 %v206_v12, %v205_v11  ;;  %1493 = vmatprep.subr.msk.bf16.mxu1 %vm1843_vm1, %v1491_v9  ;;  %v1497_v19 = vpack.c.bf16 %v224_v17, %v223_v16  ;;  %v175_v20 = vld [vmem:[%s1839_s30 + $0x10] sm:$0xff]  ;;  %v176_v21 = vld [vmem:[%s1839_s30 + $0x18] sm:$0xff]  ;;  %v193_v25 = vld [vmem:[%s1839_s30 + $0xa0] sm:$0xff] }
  0x1d   : > { %1448 = vmatpush3.bf16.xpose.msk.msra.mxu0 %vm1843_vm1, %v1446_v10  ;;  %v207_v22 = vld [vmem:[%s1839_s30 + $0x110] sm:$0xff]  ;;  %v208_v24 = vld [vmem:[%s1839_s30 + $0x118] sm:$0xff]  ;;  %v194_v26 = vld [vmem:[%s1839_s30 + $0xa8] sm:$0xff]  ;;  %v1452_v29 = vpack.c.bf16 %v176_v21, %v175_v20  ;;  %p1702_p3 = pnand %p1701_p2, %p1695_p13 }
  0x1e   : > { %1496 = vmatpush3.bf16.xpose.msk.msra.mxu1 %vm1843_vm1, %v1494_v14  ;;  %1451 = vmatprep.subr.msk.bf16.mxu0 %vm1843_vm1, %v1449_v18  ;;  %v225_v27 = vld [vmem:[%s1839_s30 + $0x1a0] sm:$0xff]  ;;  %v226_v28 = vld [vmem:[%s1839_s30 + $0x1a8] sm:$0xff]  ;;  %v1500_v30 = vpack.c.bf16 %v208_v24, %v207_v22  ;;  %v1455_v31 = vpack.c.bf16 %v194_v26, %v193_v25  ;;  %v195_v37 = vld [vmem:[%s1839_s30 + $0xb0] sm:$0xff] }
  0x1f   : > { %1499 = vmatprep.subr.msk.bf16.mxu1 %vm1843_vm1, %v1497_v19  ;;  %v1503_v32 = vpack.c.bf16 %v226_v28, %v225_v27  ;;  %v177_v33 = vld [vmem:[%s1839_s30 + $0x20] sm:$0xff]  ;;  %v178_v34 = vld [vmem:[%s1839_s30 + $0x28] sm:$0xff]  ;;  %v196_v38 = vld [vmem:[%s1839_s30 + $0xb8] sm:$0xff] }
  0x20   : > { %v209_v35 = vld [vmem:[%s1839_s30 + $0x120] sm:$0xff]  ;;  %v210_v36 = vld [vmem:[%s1839_s30 + $0x128] sm:$0xff]  ;;  %v227_v39 = vld [vmem:[%s1839_s30 + $0x1b0] sm:$0xff]  ;;  %v1458_v41 = vpack.c.bf16 %v178_v34, %v177_v33  ;;  %v1461_v43 = vpack.c.bf16 %v196_v38, %v195_v37 }
  0x21   : > { %v228_v40 = vld [vmem:[%s1839_s30 + $0x1b8] sm:$0xff]  ;;  %v1506_v42 = vpack.c.bf16 %v210_v36, %v209_v35  ;;  %v179_v45 = vld [vmem:[%s1839_s30 + $0x30] sm:$0xff]  ;;  %v197_v49 = vld [vmem:[%s1839_s30 + $0xc0] sm:$0xff] }
  0x22   : > { %v1509_v44 = vpack.c.bf16 %v228_v40, %v227_v39  ;;  %v180_v46 = vld [vmem:[%s1839_s30 + $0x38] sm:$0xff]  ;;  %v211_v47 = vld [vmem:[%s1839_s30 + $0x130] sm:$0xff]  ;;  %v198_v50 = vld [vmem:[%s1839_s30 + $0xc8] sm:$0xff] }
  0x23   : > { %v212_v48 = vld [vmem:[%s1839_s30 + $0x138] sm:$0xff]  ;;  %v229_v51 = vld [vmem:[%s1839_s30 + $0x1c0] sm:$0xff]  ;;  %v230_v52 = vld [vmem:[%s1839_s30 + $0x1c8] sm:$0xff]  ;;  %v1464_v53 = vpack.c.bf16 %v180_v46, %v179_v45  ;;  %v1467_v55 = vpack.c.bf16 %v198_v50, %v197_v49 }
  0x24   : > { %v1512_v54 = vpack.c.bf16 %v212_v48, %v211_v47  ;;  %v1515_v56 = vpack.c.bf16 %v230_v52, %v229_v51  ;;  %v181_v57 = vld [vmem:[%s1839_s30 + $0x40] sm:$0xff]  ;;  %v182_v58 = vld [vmem:[%s1839_s30 + $0x48] sm:$0xff]  ;;  %v199_v61 = vld [vmem:[%s1839_s30 + $0xd0] sm:$0xff] }
  0x25   : > { %1454 = vmatpush3.bf16.xpose.msk.msra.mxu0 %vm1843_vm1, %v1452_v29  ;;  %v213_v59 = vld [vmem:[%s1839_s30 + $0x140] sm:$0xff]  ;;  %v214_v60 = vld [vmem:[%s1839_s30 + $0x148] sm:$0xff]  ;;  %v200_v62 = vld [vmem:[%s1839_s30 + $0xd8] sm:$0xff]  ;;  %v1470_v3 = vpack.c.bf16 %v182_v58, %v181_v57 }
  0x26   : > { %1502 = vmatpush3.bf16.xpose.msk.msra.mxu1 %vm1843_vm1, %v1500_v30  ;;  %1457 = vmatprep.subr.msk.bf16.mxu0 %vm1843_vm1, %v1455_v31  ;;  %v231_v63 = vld [vmem:[%s1839_s30 + $0x1d0] sm:$0xff]  ;;  %v232_v2 = vld [vmem:[%s1839_s30 + $0x1d8] sm:$0xff]  ;;  %v1518_v4 = vpack.c.bf16 %v214_v60, %v213_v59  ;;  %v1473_v5 = vpack.c.bf16 %v200_v62, %v199_v61  ;;  %v201_v11 = vld [vmem:[%s1839_s30 + $0xe0] sm:$0xff] }
  0x27   : > { %1505 = vmatprep.subr.msk.bf16.mxu1 %vm1843_vm1, %v1503_v32  ;;  %v1521_v6 = vpack.c.bf16 %v232_v2, %v231_v63  ;;  %v183_v7 = vld [vmem:[%s1839_s30 + $0x50] sm:$0xff]  ;;  %v184_v8 = vld [vmem:[%s1839_s30 + $0x58] sm:$0xff]  ;;  %v202_v12 = vld [vmem:[%s1839_s30 + $0xe8] sm:$0xff] }
  0x28   : > { %v215_v9 = vld [vmem:[%s1839_s30 + $0x150] sm:$0xff]  ;;  %v216_v10 = vld [vmem:[%s1839_s30 + $0x158] sm:$0xff]  ;;  %v233_v13 = vld [vmem:[%s1839_s30 + $0x1e0] sm:$0xff]  ;;  %v1476_v15 = vpack.c.bf16 %v184_v8, %v183_v7  ;;  %v1479_v17 = vpack.c.bf16 %v202_v12, %v201_v11 }
  0x29   : > { %v234_v14 = vld [vmem:[%s1839_s30 + $0x1e8] sm:$0xff]  ;;  %v1524_v16 = vpack.c.bf16 %v216_v10, %v215_v9  ;;  %v301_v19 = vld [vmem:[%s2196_s2] sm:$0x7]  ;;  %v203_v24 = vld [vmem:[%s1839_s30 + $0xf0] sm:$0xff] }
  0x2a   : > { %v1527_v18 = vpack.c.bf16 %v234_v14, %v233_v13  ;;  %304 = vperm.xlu0 %1675, %v301_v19   ;;  %v185_v20 = vld [vmem:[%s1839_s30 + $0x60] sm:$0xff]  ;;  %v186_v21 = vld [vmem:[%s1839_s30 + $0x68] sm:$0xff]  ;;  %v204_v25 = vld [vmem:[%s1839_s30 + $0xf8] sm:$0xff] }
  0x2b   : > { %v217_v22 = vld [vmem:[%s1839_s30 + $0x160] sm:$0xff]  ;;  %v218_v23 = vld [vmem:[%s1839_s30 + $0x168] sm:$0xff]  ;;  %v235_v26 = vld [vmem:[%s1839_s30 + $0x1f0] sm:$0xff]  ;;  %v1482_v28 = vpack.c.bf16 %v186_v21, %v185_v20  ;;  %v1485_v30 = vpack.c.bf16 %v204_v25, %v203_v24 }
  0x2c   : > { %v236_v27 = vld [vmem:[%s1839_s30 + $0x1f8] sm:$0xff]  ;;  %v1530_v29 = vpack.c.bf16 %v218_v23, %v217_v22  ;;  %v187_v32 = vld [vmem:[%s1839_s30 + $0x70] sm:$0xff]  ;;  %v253_v36 = vld [vmem:[%s1839_s30 + $0x280] sm:$0xff] }
  0x2d   : > { %1460 = vmatpush3.bf16.xpose.msk.msra.mxu0 %vm1843_vm1, %v1458_v41  ;;  %v1533_v31 = vpack.c.bf16 %v236_v27, %v235_v26  ;;  %v188_v33 = vld [vmem:[%s1839_s30 + $0x78] sm:$0xff]  ;;  %v219_v34 = vld [vmem:[%s1839_s30 + $0x170] sm:$0xff]  ;;  %v254_v37 = vld [vmem:[%s1839_s30 + $0x288] sm:$0xff] }
  0x2e   : > { %1508 = vmatpush3.bf16.xpose.msk.msra.mxu1 %vm1843_vm1, %v1506_v42  ;;  %1463 = vmatprep.subr.msk.bf16.mxu0 %vm1843_vm1, %v1461_v43  ;;  %v220_v35 = vld [vmem:[%s1839_s30 + $0x178] sm:$0xff]  ;;  %v285_v38 = vld [vmem:[%s1839_s30 + $0x380] sm:$0xff]  ;;  %v286_v39 = vld [vmem:[%s1839_s30 + $0x388] sm:$0xff]  ;;  %v1488_v40 = vpack.c.bf16 %v188_v33, %v187_v32  ;;  %v1539_v42 = vpack.c.bf16 %v254_v37, %v253_v36 }
  0x2f   : > { %1511 = vmatprep.subr.msk.bf16.mxu1 %vm1843_vm1, %v1509_v44  ;;  %v1536_v41 = vpack.c.bf16 %v220_v35, %v219_v34  ;;  %v1587_v43 = vpack.c.bf16 %v286_v39, %v285_v38  ;;  %v237_v44 = vld [vmem:[%s1839_s30 + $0x200] sm:$0xff]  ;;  %v238_v45 = vld [vmem:[%s1839_s30 + $0x208] sm:$0xff]  ;;  %v255_v48 = vld [vmem:[%s1839_s30 + $0x290] sm:$0xff] }
  0x30   : > { %v269_v46 = vld [vmem:[%s1839_s30 + $0x300] sm:$0xff]  ;;  %v270_v47 = vld [vmem:[%s1839_s30 + $0x308] sm:$0xff]  ;;  %v256_v49 = vld [vmem:[%s1839_s30 + $0x298] sm:$0xff]  ;;  %v1542_v52 = vpack.c.bf16 %v238_v45, %v237_v44 }
  0x31   : > { %v287_v50 = vld [vmem:[%s1839_s30 + $0x390] sm:$0xff]  ;;  %v288_v51 = vld [vmem:[%s1839_s30 + $0x398] sm:$0xff]  ;;  %v257_v60 = vld [vmem:[%s1839_s30 + $0x2a0] sm:$0xff] }
  0x32   : > { %v240_v57 = vld [vmem:[%s1839_s30 + $0x218] sm:$0xff]  ;;  %v271_v58 = vld [vmem:[%s1839_s30 + $0x310] sm:$0xff]  ;;  %v258_v61 = vld [vmem:[%s1839_s30 + $0x2a8] sm:$0xff] }
  0x33   : > { %v272_v59 = vld [vmem:[%s1839_s30 + $0x318] sm:$0xff]  ;;  %v289_v62 = vld [vmem:[%s1839_s30 + $0x3a0] sm:$0xff]  ;;  %v290_v63 = vld [vmem:[%s1839_s30 + $0x3a8] sm:$0xff] }
  0x34   : > { %v242_v7 = vld [vmem:[%s1839_s30 + $0x228] sm:$0xff]  ;;  %v273_v8 = vld [vmem:[%s1839_s30 + $0x320] sm:$0xff]  ;;  %v259_v10 = vld [vmem:[%s1839_s30 + $0x2b0] sm:$0xff] }
  0x35   : > { %1466 = vmatpush3.bf16.xpose.msk.msra.mxu0 %vm1843_vm1, %v1464_v53  ;;  %v1590_v53 = vpack.c.bf16 %v270_v47, %v269_v46  ;;  %v274_v9 = vld [vmem:[%s1839_s30 + $0x328] sm:$0xff]  ;;  %v260_v11 = vld [vmem:[%s1839_s30 + $0x2b8] sm:$0xff]  ;;  %v291_v12 = vld [vmem:[%s1839_s30 + $0x3b0] sm:$0xff] }
  0x36   : > { %1514 = vmatpush3.bf16.xpose.msk.msra.mxu1 %vm1843_vm1, %v1512_v54  ;;  %1469 = vmatprep.subr.msk.bf16.mxu0 %vm1843_vm1, %v1467_v55  ;;  %v1545_v54 = vpack.c.bf16 %v256_v49, %v255_v48  ;;  %v1593_v55 = vpack.c.bf16 %v288_v51, %v287_v50  ;;  %v292_v13 = vld [vmem:[%s1839_s30 + $0x3b8] sm:$0xff]  ;;  %v275_v20 = vld [vmem:[%s1839_s30 + $0x330] sm:$0xff]  ;;  %v261_v22 = vld [vmem:[%s1839_s30 + $0x2c0] sm:$0xff] }
  0x37   : > { %1517 = vmatprep.subr.msk.bf16.mxu1 %vm1843_vm1, %v1515_v56  ;;  %v239_v56 = vld [vmem:[%s1839_s30 + $0x210] sm:$0xff]  ;;  %v244_v19 = vld [vmem:[%s1839_s30 + $0x238] sm:$0xff]  ;;  %v262_v23 = vld [vmem:[%s1839_s30 + $0x2c8] sm:$0xff] }
  0x38   : > { %v1548_v2 = vpack.c.bf16 %v240_v57, %v239_v56  ;;  %v276_v21 = vld [vmem:[%s1839_s30 + $0x338] sm:$0xff]  ;;  %v293_v24 = vld [vmem:[%s1839_s30 + $0x3c0] sm:$0xff]  ;;  %v294_v25 = vld [vmem:[%s1839_s30 + $0x3c8] sm:$0xff] }
  0x39   : > { %v1608_v27 = vpack.c.bf16 %v276_v21, %v275_v20  ;;  %v277_v32 = vld [vmem:[%s1839_s30 + $0x340] sm:$0xff]  ;;  %v278_v33 = vld [vmem:[%s1839_s30 + $0x348] sm:$0xff]  ;;  %v263_v34 = vld [vmem:[%s1839_s30 + $0x2d0] sm:$0xff] }
  0x3a   : > { %v264_v35 = vld [vmem:[%s1839_s30 + $0x2d8] sm:$0xff]  ;;  %v295_v36 = vld [vmem:[%s1839_s30 + $0x3d0] sm:$0xff]  ;;  %v1614_v39 = vpack.c.bf16 %v278_v33, %v277_v32  ;;  %v265_v46 = vld [vmem:[%s1839_s30 + $0x2e0] sm:$0xff] }
  0x3b   : > { %v296_v37 = vld [vmem:[%s1839_s30 + $0x3d8] sm:$0xff]  ;;  %v279_v44 = vld [vmem:[%s1839_s30 + $0x350] sm:$0xff]  ;;  %v266_v47 = vld [vmem:[%s1839_s30 + $0x2e8] sm:$0xff] }
  0x3c   : > { %v280_v45 = vld [vmem:[%s1839_s30 + $0x358] sm:$0xff]  ;;  %v297_v48 = vld [vmem:[%s1839_s30 + $0x3e0] sm:$0xff]  ;;  %v298_v49 = vld [vmem:[%s1839_s30 + $0x3e8] sm:$0xff] }
  0x3d   : > { %1472 = vmatpush3.bf16.xpose.msk.msra.mxu0 %vm1843_vm1, %v1470_v3  ;;  %v1596_v3 = vpack.c.bf16 %v272_v59, %v271_v58  ;;  %v1620_v51 = vpack.c.bf16 %v280_v45, %v279_v44  ;;  %v281_v56 = vld [vmem:[%s1839_s30 + $0x360] sm:$0xff]  ;;  %v282_v57 = vld [vmem:[%s1839_s30 + $0x368] sm:$0xff]  ;;  %v267_v58 = vld [vmem:[%s1839_s30 + $0x2f0] sm:$0xff] }
  0x3e   : > { %1520 = vmatpush3.bf16.xpose.msk.msra.mxu1 %vm1843_vm1, %v1518_v4  ;;  %1475 = vmatprep.subr.msk.bf16.mxu0 %vm1843_vm1, %v1473_v5  ;;  %v1551_v4 = vpack.c.bf16 %v258_v61, %v257_v60  ;;  %v1599_v5 = vpack.c.bf16 %v290_v63, %v289_v62  ;;  %v268_v59 = vld [vmem:[%s1839_s30 + $0x2f8] sm:$0xff]  ;;  %v299_v60 = vld [vmem:[%s1839_s30 + $0x3f0] sm:$0xff]  ;;  %v1626_v63 = vpack.c.bf16 %v282_v57, %v281_v56 }
  0x3f   : > { %1523 = vmatprep.subr.msk.bf16.mxu1 %vm1843_vm1, %v1521_v6  ;;  %v241_v6 = vld [vmem:[%s1839_s30 + $0x220] sm:$0xff]  ;;  %v300_v61 = vld [vmem:[%s1839_s30 + $0x3f8] sm:$0xff] }
  0x40   : > { %v1554_v14 = vpack.c.bf16 %v242_v7, %v241_v6  ;;  %v283_v6 = vld [vmem:[%s1839_s30 + $0x370] sm:$0xff]  ;;  %v284_v7 = vld [vmem:[%s1839_s30 + $0x378] sm:$0xff] }
  0x45   : > { %1478 = vmatpush3.bf16.xpose.msk.msra.mxu0 %vm1843_vm1, %v1476_v15  ;;  %v1602_v15 = vpack.c.bf16 %v274_v9, %v273_v8  ;;  %v1632_v9 = vpack.c.bf16 %v284_v7, %v283_v6 }
  0x46   : > { %1526 = vmatpush3.bf16.xpose.msk.msra.mxu1 %vm1843_vm1, %v1524_v16  ;;  %1481 = vmatprep.subr.msk.bf16.mxu0 %vm1843_vm1, %v1479_v17  ;;  %v1557_v16 = vpack.c.bf16 %v260_v11, %v259_v10  ;;  %v1605_v17 = vpack.c.bf16 %v292_v13, %v291_v12 }
  0x47   : > { %1529 = vmatprep.subr.msk.bf16.mxu1 %vm1843_vm1, %v1527_v18  ;;  %v243_v18 = vld [vmem:[%s1839_s30 + $0x230] sm:$0xff] }
  0x48   : > { %v1560_v26 = vpack.c.bf16 %v244_v19, %v243_v18 }
  0x4d   : > { %1484 = vmatpush3.bf16.xpose.msk.msra.mxu0 %vm1843_vm1, %v1482_v28  ;;  %v1563_v28 = vpack.c.bf16 %v262_v23, %v261_v22 }
  0x4e   : > { %1532 = vmatpush3.bf16.xpose.msk.msra.mxu1 %vm1843_vm1, %v1530_v29  ;;  %1487 = vmatprep.subr.msk.bf16.mxu0 %vm1843_vm1, %v1485_v30  ;;  %v1611_v29 = vpack.c.bf16 %v294_v25, %v293_v24  ;;  %v245_v30 = vld [vmem:[%s1839_s30 + $0x240] sm:$0xff] }
  0x4f   : > { %1535 = vmatprep.subr.msk.bf16.mxu1 %vm1843_vm1, %v1533_v31  ;;  %v246_v31 = vld [vmem:[%s1839_s30 + $0x248] sm:$0xff] }
  0x50   : > { %v1566_v38 = vpack.c.bf16 %v246_v31, %v245_v30 }
  0x55   : > { %1490 = vmatpush3.bf16.xpose.msk.msra.mxu0 %vm1843_vm1, %v1488_v40  ;;  %v1569_v40 = vpack.c.bf16 %v264_v35, %v263_v34 }
  0x56   : > { %1538 = vmatpush3.bf16.xpose.msk.msra.mxu1 %vm1843_vm1, %v1536_v41  ;;  %1541 = vmatprep.subr.msk.bf16.mxu0 %vm1843_vm1, %v1539_v42  ;;  %v1617_v41 = vpack.c.bf16 %v296_v37, %v295_v36  ;;  %v247_v42 = vld [vmem:[%s1839_s30 + $0x250] sm:$0xff] }
  0x57   : > { %1589 = vmatprep.subr.msk.bf16.mxu1 %vm1843_vm1, %v1587_v43  ;;  %v248_v43 = vld [vmem:[%s1839_s30 + $0x258] sm:$0xff] }
  0x58   : > { %v1572_v50 = vpack.c.bf16 %v248_v43, %v247_v42 }
  0x5c   : > { %1340 = vmatmul.mubr.msk.f32.vlgmr.msra.gmra.mrb[0].mxu0 %vm307_vm0, %v1830_v0 }
  0x5d   : > { %1374 = vmatmul.mubr.msk.f32.vlgmr.msra.gmra.mrb[0].mxu1 %vm307_vm0, %v1830_v0  ;;  %1544 = vmatpush3.bf16.xpose.msk.msra.mxu0 %vm1843_vm1, %v1542_v52  ;;  %v1575_v52 = vpack.c.bf16 %v266_v47, %v265_v46 }
  0x5e   : > { %1592 = vmatpush3.bf16.xpose.msk.msra.mxu1 %vm1843_vm1, %v1590_v53  ;;  %1547 = vmatprep.subr.msk.bf16.mxu0 %vm1843_vm1, %v1545_v54  ;;  %v1623_v53 = vpack.c.bf16 %v298_v49, %v297_v48  ;;  %v249_v54 = vld [vmem:[%s1839_s30 + $0x260] sm:$0xff] }
  0x5f   : > { %1595 = vmatprep.subr.msk.bf16.mxu1 %vm1843_vm1, %v1593_v55  ;;  %1407 = vmatprep.mubr.msk.f32.mxu0 %vm307_vm0, %v1830_v0  ;;  %v250_v55 = vld [vmem:[%s1839_s30 + $0x268] sm:$0xff] }
  0x60   : > { %1441 = vmatprep.mubr.msk.f32.mxu1 %vm307_vm0, %v1830_v0  ;;  %v1578_v62 = vpack.c.bf16 %v250_v55, %v249_v54 }
  0x65   : > { %1550 = vmatpush3.bf16.xpose.msk.msra.mxu0 %vm1843_vm1, %v1548_v2  ;;  %v1581_v2 = vpack.c.bf16 %v268_v59, %v267_v58 }
  0x66   : > { %1598 = vmatpush3.bf16.xpose.msk.msra.mxu1 %vm1843_vm1, %v1596_v3  ;;  %1553 = vmatprep.subr.msk.bf16.mxu0 %vm1843_vm1, %v1551_v4  ;;  %v1629_v3 = vpack.c.bf16 %v300_v61, %v299_v60  ;;  %v251_v4 = vld [vmem:[%s1839_s30 + $0x270] sm:$0xff] }
  0x67   : > { %1601 = vmatprep.subr.msk.bf16.mxu1 %vm1843_vm1, %v1599_v5  ;;  %v252_v5 = vld [vmem:[%s1839_s30 + $0x278] sm:$0xff] }
  0x68   : > { %v1584_v8 = vpack.c.bf16 %v252_v5, %v251_v4 }
  0x6d   : > { %1556 = vmatpush3.bf16.xpose.msk.msra.mxu0 %vm1843_vm1, %v1554_v14 }
  0x6e   : > { %1604 = vmatpush3.bf16.xpose.msk.msra.mxu1 %vm1843_vm1, %v1602_v15  ;;  %1559 = vmatprep.subr.msk.bf16.mxu0 %vm1843_vm1, %v1557_v16 }
  0x6f   : > { %1607 = vmatprep.subr.msk.bf16.mxu1 %vm1843_vm1, %v1605_v17 }
  0x75   : > { %1562 = vmatpush3.bf16.xpose.msk.msra.mxu0 %vm1843_vm1, %v1560_v26 }
  0x76   : > { %1610 = vmatpush3.bf16.xpose.msk.msra.mxu1 %vm1843_vm1, %v1608_v27  ;;  %1565 = vmatprep.subr.msk.bf16.mxu0 %vm1843_vm1, %v1563_v28 }
  0x77   : > { %1613 = vmatprep.subr.msk.bf16.mxu1 %vm1843_vm1, %v1611_v29 }
  0x7d   : > { %1568 = vmatpush3.bf16.xpose.msk.msra.mxu0 %vm1843_vm1, %v1566_v38 }
  0x7e   : > { %1616 = vmatpush3.bf16.xpose.msk.msra.mxu1 %vm1843_vm1, %v1614_v39  ;;  %1571 = vmatprep.subr.msk.bf16.mxu0 %vm1843_vm1, %v1569_v40 }
  0x7f   : > { %1619 = vmatprep.subr.msk.bf16.mxu1 %vm1843_vm1, %v1617_v41 }
  0x85   : > { %1574 = vmatpush3.bf16.xpose.msk.msra.mxu0 %vm1843_vm1, %v1572_v50 }
  0x86   : > { %1622 = vmatpush3.bf16.xpose.msk.msra.mxu1 %vm1843_vm1, %v1620_v51  ;;  %1577 = vmatprep.subr.msk.bf16.mxu0 %vm1843_vm1, %v1575_v52 }
  0x87   : > { %1625 = vmatprep.subr.msk.bf16.mxu1 %vm1843_vm1, %v1623_v53 }
  0x8d   : > { %1580 = vmatpush3.bf16.xpose.msk.msra.mxu0 %vm1843_vm1, %v1578_v62 }
  0x8e   : > { %1628 = vmatpush3.bf16.xpose.msk.msra.mxu1 %vm1843_vm1, %v1626_v63  ;;  %1583 = vmatprep.subr.msk.bf16.mxu0 %vm1843_vm1, %v1581_v2 }
  0x8f   : > { %1631 = vmatprep.subr.msk.bf16.mxu1 %vm1843_vm1, %v1629_v3 }
  0x95   : > { %1586 = vmatpush3.bf16.xpose.msk.msra.mxu0 %vm1843_vm1, %v1584_v8 }
  0x96   : > { %1634 = vmatpush3.bf16.xpose.msk.msra.mxu1 %vm1843_vm1, %v1632_v9 }
  0x9c   : > { %1408 = vmatmul.mubr.msk.f32.vlgmr.msra.gmra.mrb[2].mxu0 %vm307_vm0, %v1830_v0 }
  0x9d   : > { %1442 = vmatmul.mubr.msk.f32.vlgmr.msra.gmra.mrb[2].mxu1 %vm307_vm0, %v1830_v0 }
  0xa9   : > { %v2118_v10 = vpop.permute.xlu0 %304 }
 0x12f   : > { %v761_v11 = vpop.f32.mrb[0].mxu0 }
 0x130   : > { %v762_v12 = vadd.f32 %v761_v11, %v2118_v10  ;;  %v832_v13 = vpop.f32.mrb[0].mxu1  ;;  %v763_v14 = vpop.f32.mrb[1].mxu0 }
 0x131   : > { %v833_v15 = vadd.f32 %v832_v13, %v2118_v10  ;;  %v764_v16 = vadd.f32 %v763_v14, %v2118_v10  ;;  %v834_v1 = vpop.f32.mrb[1].mxu1 }
 0x132   : > { %v979_v17 = vmul.f32 %v762_v12, %v762_v12  ;;  %v835_v18 = vadd.f32 %v834_v1, %v2118_v10 }
 0x133   : > { %v981_v19 = vmul.f32 %v833_v15, %v833_v15  ;;  %v980_v20 = vmul.f32 %v764_v16, %v764_v16 }
 0x134   : > { %v988_v0 = vsel %vm987_vm2, %v979_v17, 0.0  ;;  %v982_v21 = vmul.f32 %v835_v18, %v835_v18 }
 0x135   : > { %v989_v22 = vrot.slane %v988_v0, 4  ;;  %v1002_v23 = vsel %vm987_vm2, %v981_v19, 0.0  ;;  %v995_v24 = vsel %vm987_vm2, %v980_v20, 0.0 }
 0x136   : > { %v1003_v25 = vrot.slane %v1002_v23, 4  ;;  %v996_v26 = vrot.slane %v995_v24, 4  ;;  %v1009_v27 = vsel %vm987_vm2, %v982_v21, 0.0 }
 0x137   : > { %v990_v28 = vadd.f32 %v989_v22, %v988_v0  ;;  %v1010_v29 = vrot.slane %v1009_v27, 4 }
 0x138   : > { %v1004_v30 = vadd.f32 %v1003_v25, %v1002_v23  ;;  %v997_v31 = vadd.f32 %v996_v26, %v995_v24 }
 0x139   : > { %v991_v32 = vrot.slane %v990_v28, 2  ;;  %v1011_v33 = vadd.f32 %v1010_v29, %v1009_v27 }
 0x13a   : > { %v1005_v34 = vrot.slane %v1004_v30, 2  ;;  %v998_v35 = vrot.slane %v997_v31, 2 }
 0x13b   : > { %v992_v36 = vadd.f32 %v991_v32, %v990_v28  ;;  %v1012_v37 = vrot.slane %v1011_v33, 2 }
 0x13c   : > { %v1006_v38 = vadd.f32 %v1005_v34, %v1004_v30  ;;  %v999_v39 = vadd.f32 %v998_v35, %v997_v31 }
 0x13d   : > { %v993_v40 = vrot.slane %v992_v36, 1  ;;  %v1013_v41 = vadd.f32 %v1012_v37, %v1011_v33 }
 0x13e   : > { %v1007_v42 = vrot.slane %v1006_v38, 1  ;;  %v1000_v43 = vrot.slane %v999_v39, 1 }
 0x13f   : > { %v994_v44 = vadd.f32 %v993_v40, %v992_v36  ;;  %v1014_v45 = vrot.slane %v1013_v41, 1 }
 0x140   : > { %v1008_v46 = vadd.f32 %v1007_v42, %v1006_v38  ;;  %v1001_v47 = vadd.f32 %v1000_v43, %v999_v39 }
 0x141   : > { %v1044_v48 = vmax.f32 %v994_v44, 1e-24  ;;  %v1015_v49 = vadd.f32 %v1014_v45, %v1013_v41 }
 0x142   : > { %v1046_v50 = vmax.f32 %v1008_v46, 1e-24  ;;  %v1045_v51 = vmax.f32 %v1001_v47, 1e-24 }
 0x143   : > { %1676 = vrsqrt.f32 %v1044_v48  ;;  %v1047_v52 = vmax.f32 %v1015_v49, 1e-24 }
 0x144   : > { %1678 = vrsqrt.f32 %v1046_v50 }
 0x145   : > { %1680 = vrsqrt.f32 %v1045_v51 }
 0x146   : > { %1682 = vrsqrt.f32 %v1047_v52 }
 0x14d   : > { %v1677_v53 = vpop.eup %1676 }
 0x14e   : > { %v1679_v54 = vpop.eup %1678  ;;  %v1060_v55 = vmul.f32 %v1677_v53, %v762_v12 }
 0x14f   : > { %v1681_v56 = vpop.eup %1680  ;;  %v1062_v57 = vmul.f32 %v1679_v54, %v833_v15 }
 0x150   : > { %v1683_v58 = vpop.eup %1682  ;;  %v1061_v59 = vmul.f32 %v1681_v56, %v764_v16 }
 0x151   : > { %v1063_v60 = vmul.f32 %v1683_v58, %v835_v18 }
 0x152   : > { %v1076_v61 = vcombine.low %v1060_v55, %v1061_v59 }
 0x153   : > { %v1077_v62 = vcombine.low %v1062_v57, %v1063_v60 }
 0x154   : > { %1084 = vst [vmem:[%s2131_s8] sm:$0x77] %v1076_v61 }
 0x155   : > { %1085 = vst [vmem:[%s2131_s8 + $0x8] sm:$0x77] %v1077_v62 }
 0x16f   : > { %v903_v63 = vpop.f32.mrb[2].mxu0 }
 0x170   : > { %v904_v2 = vadd.f32 %v903_v63, %v2118_v10  ;;  %v974_v3 = vpop.f32.mrb[2].mxu1  ;;  %v905_v4 = vpop.f32.mrb[3].mxu0 }
 0x171   : > { %v975_v5 = vadd.f32 %v974_v3, %v2118_v10  ;;  %v906_v6 = vadd.f32 %v905_v4, %v2118_v10  ;;  %v976_v7 = vpop.f32.mrb[3].mxu1 }
 0x172   : > { %v983_v8 = vmul.f32 %v904_v2, %v904_v2  ;;  %v977_v9 = vadd.f32 %v976_v7, %v2118_v10 }
 0x173   : > { %v985_v11 = vmul.f32 %v975_v5, %v975_v5  ;;  %v984_v12 = vmul.f32 %v906_v6, %v906_v6 }
 0x174   : > { %v1016_v13 = vsel %vm987_vm2, %v983_v8, 0.0  ;;  %v986_v14 = vmul.f32 %v977_v9, %v977_v9 }
 0x175   : > { %v1017_v15 = vrot.slane %v1016_v13, 4  ;;  %v1030_v16 = vsel %vm987_vm2, %v985_v11, 0.0  ;;  %v1023_v1 = vsel %vm987_vm2, %v984_v12, 0.0 }
 0x176   : > { %v1031_v17 = vrot.slane %v1030_v16, 4  ;;  %v1024_v18 = vrot.slane %v1023_v1, 4  ;;  %v1037_v19 = vsel %vm987_vm2, %v986_v14, 0.0 }
 0x177   : > { %v1018_v20 = vadd.f32 %v1017_v15, %v1016_v13  ;;  %v1038_v0 = vrot.slane %v1037_v19, 4 }
 0x178   : > { %v1032_v21 = vadd.f32 %v1031_v17, %v1030_v16  ;;  %v1025_v22 = vadd.f32 %v1024_v18, %v1023_v1 }
 0x179   : > { %v1019_v23 = vrot.slane %v1018_v20, 2  ;;  %v1039_v10 = vadd.f32 %v1038_v0, %v1037_v19 }
 0x17a   : > { %v1033_v24 = vrot.slane %v1032_v21, 2  ;;  %v1026_v25 = vrot.slane %v1025_v22, 2 }
 0x17b   : > { %v1020_v26 = vadd.f32 %v1019_v23, %v1018_v20  ;;  %v1040_v27 = vrot.slane %v1039_v10, 2 }
 0x17c   : > { %v1034_v28 = vadd.f32 %v1033_v24, %v1032_v21  ;;  %v1027_v29 = vadd.f32 %v1026_v25, %v1025_v22 }
 0x17d   : > { %v1021_v30 = vrot.slane %v1020_v26, 1  ;;  %v1041_v31 = vadd.f32 %v1040_v27, %v1039_v10 }
 0x17e   : > { %v1035_v32 = vrot.slane %v1034_v28, 1  ;;  %v1028_v33 = vrot.slane %v1027_v29, 1 }
 0x17f   : > { %v1022_v34 = vadd.f32 %v1021_v30, %v1020_v26  ;;  %v1042_v35 = vrot.slane %v1041_v31, 1 }
 0x180   : > { %v1036_v36 = vadd.f32 %v1035_v32, %v1034_v28  ;;  %v1029_v37 = vadd.f32 %v1028_v33, %v1027_v29 }
 0x181   : > { %v1048_v38 = vmax.f32 %v1022_v34, 1e-24  ;;  %v1043_v39 = vadd.f32 %v1042_v35, %v1041_v31 }
 0x182   : > { %v1050_v40 = vmax.f32 %v1036_v36, 1e-24  ;;  %v1049_v41 = vmax.f32 %v1029_v37, 1e-24 }
 0x183   : > { %1684 = vrsqrt.f32 %v1048_v38  ;;  %v1051_v42 = vmax.f32 %v1043_v39, 1e-24 }
 0x184   : > { %1686 = vrsqrt.f32 %v1050_v40 }
 0x185   : > { %1688 = vrsqrt.f32 %v1049_v41 }
 0x186   : > { %1690 = vrsqrt.f32 %v1051_v42 }
 0x18d   : > { %v1685_v43 = vpop.eup %1684 }
 0x18e   : > { %v1687_v44 = vpop.eup %1686  ;;  %v1064_v45 = vmul.f32 %v1685_v43, %v904_v2 }
 0x18f   : > { %v1689_v46 = vpop.eup %1688  ;;  %v1066_v47 = vmul.f32 %v1687_v44, %v975_v5 }
 0x190   : > { %v1691_v48 = vpop.eup %1690  ;;  %v1065_v49 = vmul.f32 %v1689_v46, %v906_v6 }
 0x191   : > { %v1067_v50 = vmul.f32 %v1691_v48, %v977_v9 }
 0x192   : > { %v1078_v51 = vcombine.low %v1064_v45, %v1065_v49 }
 0x193   : > { %v1079_v52 = vcombine.low %v1066_v47, %v1067_v50 }
 0x194   : > { %1086 = vst [vmem:[%s2131_s8 + $0x10] sm:$0x77] %v1078_v51 }
 0x195   : > { %1087 = vst [vmem:[%s2131_s8 + $0x18] sm:$0x77] %v1079_v52 }
 0x196   : > { %1705 = shalt.err (!%p1702_p3)
}
 0x197   : > { %s1706_s27 = scalar_lea.hbm %s2148_s19, 512  ;;  %s1710_s30 = scalar_lea.hbm %s2197_s3, 1024 }
 0x198   : > { %p1707_p4 = scmp.ne.s32.totalorder %s2148_s19, %s1706_s27  ;;  %p1711_p9 = scmp.lt.u32.totalorder %s2148_s19, %s2197_s3 }
 0x199   : > { %p1712_p10 = scmp.lt.u32.totalorder %s1710_s30, %s1706_s27  ;;  %p1714_p12 = scmp.lt.u32.totalorder %s1706_s27, %s2148_s19 }
 0x19a   : > { %p1708_p7 = pnand %p1707_p4, %p1816_p5 }
 0x19b   : > { %p1713_p11 = por %p1712_p10, %p1711_p9 }
 0x19c   : > { %p1709_p8 = pneg %p1708_p7 }
 0x19d   : > { %p1715_p13 = por %p1714_p12, %p1713_p11 }
 0x19f   : > { %p1716_p0 = pnand %p1715_p13, %p1709_p8 }
 0x1a1   : > { %1719 = shalt.err (!%p1716_p0)
}
 0x1a2   : > { %1635 = dma.vmem_to_hbm [thread:$0]  (%p1816_p5), %s2150_s10, 512, %s2148_s19, %s1089_s20  }
 0x1a3 PF: > { %p1641_p1 = scmp.ge.s32.totalorder %s1754_s15, 2  ;;  %s1115_s6 = sand.u32 1, %s1742_s12  }
 0x1a4   : > { %s1116_s7 = scalar_lea.sflag [#allocation3], %s1115_s6 }
 0x1a5   : > { %p1638_p2 = pnand %p1641_p1, %p1820_p6 }
 0x1a7   : > { %1737 = dma.done.wait (!%p1638_p2), %s1116_s7, 512  }
 0x1a8   : > { %1739 = vsyncadd (!%p1638_p2), %s1116_s7, 4294966784  ;;  %p13_p3 = scmp.ge.s32.totalorder %s1803_s18, 4   ;;  %s2202_s12 = smov %s1746_s13 }
 0x1a9   : > { %s2203_s13 = smov %s1750_s14  ;;  %s2204_s14 = smov %s1814_s21 }
 0x1aa   : > { %s2205_s15 = smov %s1803_s18  ;;  %15 = sbr.rel (!%p13_p3) target bundleno = 3 (0x3), region = 67 }
 0x1b1   :  { %1121 = vsyncpa [#allocation3], 1 }
 0x1b2   :  { %1123 = vsyncpa [#allocation3 + $0x1], 1 }

</bundles_post_ra>
